<compile_context>
chip_gen: v7x
topology: tpu7x:2x2x1
jax: 0.10.0
libtpu: 0.0.40
codegen_flags: <defaults>
</compile_context>

<pallas_src>
import jax
import jax.numpy as jnp
from jax import lax
from jax.experimental import pallas as pl
from jax.experimental.pallas import tpu as pltpu

LANES = 128


def _round_up(x, m):
    return ((x + m - 1) // m) * m


def _chip_config():
    """Returns (block_bytes, max_shards, vmem_limit_bytes) per TPU generation."""
    try:
        kind = jax.devices()[0].device_kind.lower()
    except Exception:
        kind = ""
    if "v7" in kind or "7x" in kind:
        # v7x: 2 TensorCores, 64 MiB VMEM/TC, 3.2 TB/s HBM -> big blocks, 2 shards.
        # TODO(synk): if plain "parallel" does not land the shard axis on both
        #             v7x TensorCores, switch to pltpu.CORE_PARALLEL / core_map.
        return 8 << 20, 2, 40 << 20
    if "v6" in kind or "v5p" in kind:
        # v6e / v5p: single TC, 128 MiB VMEM -> 8 MiB blocks, explicit scoped limit.
        return 8 << 20, 1, 40 << 20
    # v5e / v4 / unknown: conservative (v5e scoped-VMEM default is 16 MiB).
    return 4 << 20, 1, 32 << 20


def _count_zeros_2d(x2d):
    """x2d: [rows, 128]. Returns int32 count of zero-valued elements."""
    rows = x2d.shape[0]
    assert x2d.shape[1] == LANES and rows > 0

    block_bytes, max_shards, vmem_limit = _chip_config()
    itemsize = jnp.dtype(x2d.dtype).itemsize
    packing = max(1, 4 // itemsize)            # f32:1, bf16:2, int8/fp8:4
    row_align = 8 * packing                    # native packed sublane tile (rows)

    # dtype-aware block: ~block_bytes per block, aligned to the packed tile
    max_block_rows = max(row_align,
                         (block_bytes // (itemsize * LANES)) // row_align * row_align)
    block_rows = min(max_block_rows, _round_up(rows, row_align))

    total_blocks = pl.cdiv(rows, block_rows)
    num_shards = min(max_shards, total_blocks)
    steps = pl.cdiv(total_blocks, num_shards)

    # Masked path is only needed if some block has garbage rows (partial last
    # block / block bigger than the array) or is a clamped overshoot duplicate.
    need_mask = (rows % block_rows != 0) or (total_blocks % num_shards != 0)

    groups = block_rows // 8                   # block_rows is a multiple of 8

    def _reduce(iszero):                       # (block_rows,128) i32 -> (8,128) i32
        body = iszero.reshape(groups, 8, LANES)
        if groups % 4 == 0 and groups >= 8:
            # 4 independent accumulation chains -> VALU slots pipeline instead of
            # one serial dependent-add chain of ~groups vadds.
            q = body.reshape(4, groups // 4, 8, LANES)
            p = jnp.sum(q, axis=1)
            return p[0] + p[1] + p[2] + p[3]
        return jnp.sum(body, axis=0)

    def kernel(x_ref, o_ref):
        s = pl.program_id(0)                   # parallel shard axis
        i = pl.program_id(1)                   # arbitrary (reduction) axis
        vb = s * steps + i                     # virtual block index (may overshoot)

        @pl.when(i == 0)
        def _():
            o_ref[...] = jnp.zeros_like(o_ref)

        tile = x_ref[...]                      # (block_rows, 128)

        if not need_mask:
            # fast path only: pure compare + adds, no iota/mask work per block
            o_ref[...] += _reduce((tile == 0).astype(jnp.int32))[None]
        else:
            fully_valid = jnp.logical_and((vb + 1) * block_rows <= rows,
                                          vb < total_blocks)

            @pl.when(fully_valid)
            def _():
                o_ref[...] += _reduce((tile == 0).astype(jnp.int32))[None]

            @pl.when(jnp.logical_not(fully_valid))
            def _():
                # valid rows remaining in this block (<= 0 for overshoot blocks)
                rem = rows - vb * block_rows
                local = lax.broadcasted_iota(jnp.int32, (block_rows, LANES), 0)
                iszero = jnp.logical_and(tile == 0, local < rem).astype(jnp.int32)
                o_ref[...] += _reduce(iszero)[None]

    def x_index(s, i):
        vb = s * steps + i
        # clamp overshoot blocks onto the last real block (fully masked above)
        return (jnp.minimum(vb, total_blocks - 1), 0)

    partials = pl.pallas_call(
        kernel,
        out_shape=jax.ShapeDtypeStruct((num_shards, 8, LANES), jnp.int32),
        grid_spec=pltpu.PrefetchScalarGridSpec(
            num_scalar_prefetch=0,
            grid=(num_shards, steps),
            in_specs=[pl.BlockSpec((block_rows, LANES), x_index)],
            out_specs=pl.BlockSpec((1, 8, LANES), lambda s, i: (s, 0, 0)),
        ),
        compiler_params=pltpu.CompilerParams(
            dimension_semantics=("parallel", "arbitrary"),
            vmem_limit_bytes=vmem_limit,
        ),
        cost_estimate=pl.CostEstimate(
            flops=2 * rows * LANES,
            transcendentals=0,
            bytes_accessed=rows * LANES * itemsize + num_shards * 8 * LANES * 4,
        ),
    )(x2d)

    # single tiny cross-lane reduction, done once outside the kernel
    return jnp.sum(partials)


def zero_loss(inputs, scale=False):
    """JAX/Pallas equivalent of PyTorch ZeroLoss.forward.

    PyTorch semantics:
      zeros = inputs[inputs == 0]
      scale=True  -> len(zeros) / len(inputs)   (len(inputs) == inputs.shape[0])
      scale=False -> len(zeros)
    """
    leading = inputs.shape[0]
    flat = jnp.ravel(inputs)                   # free reshape, no HBM copy
    n = flat.shape[0]

    # kernel handles the lane-aligned prefix; in-kernel row masking absorbs any
    # sublane raggedness, so only the last n % 128 elements go to plain JAX.
    main = (n // LANES) * LANES
    count = jnp.int32(0)

    if main > 0:
        if main == n:
            x2d = flat.reshape(main // LANES, LANES)          # copy-free reshape
        else:
            # TODO(synk): for n % 128 != 0 this prefix slice materializes a copy;
            #             removable via CompilerParams(allow_input_fusion=[True]).
            x2d = flat[:main].reshape(main // LANES, LANES)
        count = count + _count_zeros_2d(x2d)

    if main < n:
        tail = flat[main:]                     # < 128 elements
        count = count + jnp.sum((tail == 0).astype(jnp.int32))

    if scale:
        return count.astype(jnp.float32) / jnp.float32(leading)
    return count


if __name__ == "__main__":
    def _ref_count(x):
        return int(jnp.sum((x == 0).astype(jnp.int32)))

    key = jax.random.PRNGKey(0)
    k1, k2, k3 = jax.random.split(key, 3)

    # Primary small NCHW-style input: [2, 4, 16, 16] with forced exact zeros.
    x = jax.random.normal(k1, (2, 4, 16, 16), dtype=jnp.float32)
    mask = jax.random.bernoulli(k2, p=0.25, shape=x.shape)
    x = jnp.where(mask, jnp.zeros_like(x), x)

    count = jax.block_until_ready(zero_loss(x, scale=False))
    scaled = jax.block_until_ready(zero_loss(x, scale=True))
    ref_c = _ref_count(x)
    assert int(count) == ref_c, (int(count), ref_c)
    assert abs(float(scaled) - ref_c / x.shape[0]) < 1e-5, (float(scaled), ref_c / x.shape[0])

    # Ragged input (n % 128 != 0): exercises masked in-kernel path + JAX tail.
    y = jax.random.normal(k3, (2, 3, 17, 19), dtype=jnp.float32)
    ymask = jax.random.bernoulli(jax.random.PRNGKey(7), p=0.5, shape=y.shape)
    y = jnp.where(ymask, jnp.zeros_like(y), y)
    yc = jax.block_until_ready(zero_loss(y))
    assert int(yc) == _ref_count(y), (int(yc), _ref_count(y))

    # Larger input: exercises multi-row-group blocks + 4-way reduce split.
    z = jax.random.normal(jax.random.PRNGKey(3), (16, 4, 96, 96), dtype=jnp.float32)
    zmask = jax.random.bernoulli(jax.random.PRNGKey(4), p=0.1, shape=z.shape)
    z = jnp.where(zmask, jnp.zeros_like(z), z)
    zc = jax.block_until_ready(zero_loss(z))
    assert int(zc) == _ref_count(z), (int(zc), _ref_count(z))

    # bf16 input: exercises dtype-aware (16,128)-aligned block sizing.
    w = jax.random.normal(jax.random.PRNGKey(5), (4, 8, 32, 32), dtype=jnp.bfloat16)
    wmask = jax.random.bernoulli(jax.random.PRNGKey(6), p=0.3, shape=w.shape)
    w = jnp.where(wmask, jnp.zeros_like(w), w)
    wc = jax.block_until_ready(zero_loss(w))
    assert int(wc) == _ref_count(w), (int(wc), _ref_count(w))

    print("KERNEL_OK")
</pallas_src>

<mosaic_0001>
module attributes {stable_mosaic.version = 11 : i64} {
  func.func @kernel(%arg0: i32, %arg1: i32, %arg2: memref<16x128xf32, #tpu.memory_space<vmem>>, %arg3: memref<1x8x128xi32, #tpu.memory_space<vmem>>) attributes {dimension_semantics = [#tpu.dimension_semantics<parallel>, #tpu.dimension_semantics<arbitrary>], iteration_bounds = array<i64: 1, 1>, scalar_prefetch = 0 : i64, scratch_operands = 0 : i64, tpu.core_type = #tpu.core_type<tc>, window_params = [{transform_indices = @transform_0, window_bounds = array<i64: 16, 128>}, {transform_indices = @transform_1, window_bounds = array<i64: 1, 8, 128>}]} {
    %c0_i32 = arith.constant 0 : i32
    %0 = arith.cmpi eq, %arg1, %c0_i32 : i32
    %1 = arith.extui %0 : i1 to i32
    %c0_i32_0 = arith.constant 0 : i32
    %2 = arith.cmpi ne, %1, %c0_i32_0 : i32
    scf.if %2 {
      %c0_i32_9 = arith.constant 0 : i32
      %13 = vector.broadcast %c0_i32_9 : i32 to vector<1x8x128xi32>
      %c0_10 = arith.constant 0 : index
      %c0_11 = arith.constant 0 : index
      %c0_12 = arith.constant 0 : index
      %14 = vector.load %arg3[%c0_10, %c0_11, %c0_12] : memref<1x8x128xi32, #tpu.memory_space<vmem>>, vector<1x8x128xi32>
      tpu.vector_store %arg3[%c0_10, %c0_11, %c0_12], %13 {strides = array<i32>} : memref<1x8x128xi32, #tpu.memory_space<vmem>>, vector<1x8x128xi32>,
    } else {
    }
    %c0 = arith.constant 0 : index
    %c0_1 = arith.constant 0 : index
    %3 = vector.load %arg2[%c0, %c0_1] : memref<16x128xf32, #tpu.memory_space<vmem>>, vector<16x128xf32>
    %c0_2 = arith.constant 0 : index
    %c0_3 = arith.constant 0 : index
    %c0_4 = arith.constant 0 : index
    %4 = vector.load %arg3[%c0_2, %c0_3, %c0_4] : memref<1x8x128xi32, #tpu.memory_space<vmem>>, vector<1x8x128xi32>
    %cst = arith.constant 0.000000e+00 : f32
    %5 = vector.broadcast %cst : f32 to vector<16x128xf32>
    %6 = arith.cmpf oeq, %3, %5 : vector<16x128xf32>
    %7 = arith.extui %6 : vector<16x128xi1> to vector<16x128xi32>
    %8 = vector.shape_cast %7 : vector<16x128xi32> to vector<2x8x128xi32>
    %cst_5 = arith.constant dense<0> : vector<8x128xi32>
    %9 = vector.multi_reduction <add>, %8, %cst_5 [0] : vector<2x8x128xi32> to vector<8x128xi32>
    %10 = vector.shape_cast %9 : vector<8x128xi32> to vector<1x8x128xi32>
    %11 = arith.addi %4, %10 : vector<1x8x128xi32>
    %c0_6 = arith.constant 0 : index
    %c0_7 = arith.constant 0 : index
    %c0_8 = arith.constant 0 : index
    %12 = vector.load %arg3[%c0_6, %c0_7, %c0_8] : memref<1x8x128xi32, #tpu.memory_space<vmem>>, vector<1x8x128xi32>
    tpu.vector_store %arg3[%c0_6, %c0_7, %c0_8], %11 {strides = array<i32>} : memref<1x8x128xi32, #tpu.memory_space<vmem>>, vector<1x8x128xi32>,
    return
  }
  func.func @transform_0(%arg0: i32, %arg1: i32) -> (i32, i32) {
    %c1_i32 = arith.constant 1 : i32
    %0 = arith.muli %arg0, %c1_i32 : i32
    %1 = arith.addi %0, %arg1 : i32
    %c0_i32 = arith.constant 0 : i32
    %2 = arith.minsi %1, %c0_i32 : i32
    %c0_i32_0 = arith.constant 0 : i32
    %c0_i32_1 = arith.constant 0 : i32
    return %2, %c0_i32_0 : i32, i32
  }
  func.func @transform_1(%arg0: i32, %arg1: i32) -> (i32, i32, i32) {
    %c0_i32 = arith.constant 0 : i32
    %c0_i32_0 = arith.constant 0 : i32
    %c0_i32_1 = arith.constant 0 : i32
    return %arg0, %c0_i32, %c0_i32_0 : i32, i32, i32
  }
}

</mosaic_0001>

<bundles_post_ra>
// kernel: tpu_custom_call.1
= control target key start
LH: loop header
LB: loop body
LE: loop exit
PB: predicated region body
PF: predicated region fallthrough
CT: control target
= control target key end

     0   :  { %6 = vsyncpa [#allocation3], 0  ;;  %s157_s0 = inlined_call_operand.hbm [shape: f32[16,128], index: 0, kind: input, shape index: {}]   ;;  %s158_s1 = inlined_call_operand.hbm [shape: s32[1,8,128], index: 1, kind: output, shape index: {}]  }
   0x1   :  { %7 = vsyncpa [#allocation4], 0  ;;  %s118_s6 = smov [#allocation2]   ;;  %s70_s10 = scalar_lea.hbm %s157_s0, 256 }
   0x2   :  { %s19_s7 = sshll.u32 %s118_s6, 4  ;;  %p71_p0 = scmp.ne.s32.totalorder %s157_s0, %s70_s10  ;;  %s20_s7 = int_to_ptr.vmem [resolvable:$true] %s19_s7 }
   0x3   :  { %p74_p1 = scmp.lt.u32.totalorder %s70_s10, %s157_s0 }
   0x5   :  { %p76_p2 = pnand %p74_p1, %p71_p0 }
   0x7   :  { %79 = shalt.err (!%p76_p2)
}
   0x8   :  { %s80_s15 = scalar_lea.vmem %s20_s7, 256  ;;  %p85_p4 = scmp.lt.s32.totalorder %s20_s7, %s20_s7 }
   0x9   :  { %p81_p3 = scmp.ne.s32.totalorder %s20_s7, %s80_s15  ;;  %p86_p5 = scmp.lt.s32.totalorder %s80_s15, %s80_s15 }
   0xb   :  { %p87_p6 = por %p86_p5, %p85_p4 }
   0xd   :  { %p88_p7 = pnand %p87_p6, %p81_p3 }
   0xf   :  { %91 = shalt.err (!%p88_p7)
}
  0x10   :  { %s119_s16 = smov 128   ;;  %s120_s17 = smov 8  }
  0x11   :  { %25 = dma.hbm_to_vmem [thread:$0]  %s157_s0, 256, %s20_s7, [#allocation3], %s119_s16, %s119_s16, %s120_s17  }
  0x12   :  { %114 = dma.done.wait [#allocation3], 256  }
  0x13   :  { %115 = vsyncadd [#allocation3], 4294967040  ;;  %v38_v0 = vld [vmem:[#allocation2] sm:$0xff]  ;;  %v39_v1 = vld [vmem:[#allocation2 + $0x8] sm:$0xff]  ;;  %v121_v2 = vmov 0   ;;  %s122_s20 = smov [#allocation5]  }
  0x14   :  { %vm41_vm0 = vcmp.eq.f32.partialorder %v38_v0, 0.0  ;;  %vm42_vm1 = vcmp.eq.f32.partialorder %v39_v1, 0.0  ;;  %s54_s21 = sshll.u32 %s122_s20, 4  ;;  %s55_s21 = int_to_ptr.vmem [resolvable:$true] %s54_s21 }
  0x15   :  { %v43_v3 = vsel %vm41_vm0, 1, %v121_v2  ;;  %v44_v4 = vsel %vm42_vm1, 1, %v121_v2  ;;  %s92_s22 = scalar_lea.vmem %s55_s21, 128  ;;  %p97_p9 = scmp.lt.s32.totalorder %s55_s21, %s55_s21 }
  0x16   :  { %v45_v5 = vadd.s32 %v44_v4, %v43_v3  ;;  %p93_p8 = scmp.ne.s32.totalorder %s55_s21, %s92_s22  ;;  %p98_p10 = scmp.lt.s32.totalorder %s92_s22, %s92_s22 }
  0x18   :  { %47 = vst [vmem:[#allocation5] sm:$0xff] %v45_v5  ;;  %p99_p11 = por %p98_p10, %p97_p9 }
  0x1a   :  { %p100_p12 = pnand %p99_p11, %p93_p8 }
  0x1c   :  { %103 = shalt.err (!%p100_p12)
}
  0x1d   :  { %s104_s24 = scalar_lea.hbm %s158_s1, 128 }
  0x1e   :  { %p105_p13 = scmp.ne.s32.totalorder %s158_s1, %s104_s24  ;;  %p108_p0 = scmp.lt.u32.totalorder %s104_s24, %s158_s1 }
  0x20   :  { %p110_p1 = pnand %p108_p0, %p105_p13 }
  0x22   :  { %113 = shalt.err (!%p110_p1)
}
  0x23   :  { %57 = dma.vmem_to_hbm [thread:$0]  %s55_s21, 128, %s158_s1, [#allocation4]  }
  0x24   :  { %116 = dma.done.wait [#allocation4], 128  }
  0x25   :  { %117 = vsyncadd [#allocation4], 4294967168 }
  0x26   :  { %61 = vsyncpa [#allocation3], 1 }
  0x27   :  { %62 = vsyncpa [#allocation4], 1 }

</bundles_post_ra>
